<compile_context>
chip_gen: v5e
topology: v5e:2x2
jax: 0.10.0
libtpu: 0.0.40
codegen_flags: <defaults>
</compile_context>

<pallas_src>
import functools

import jax
import jax.numpy as jnp
from jax.experimental import pallas as pl
from jax.experimental.pallas import tpu as pltpu


def _round_up(n, m):
    return ((n + m - 1) // m) * m


def _fastgrnn_recurrence_kernel(ab_ref, wx_ref, u_ref, h_ref, *, t_total, t_chunk):
    """One grid step = one (batch-tile, time-chunk) pair.

    ab_ref : (2,)                 SMEM  [alpha, beta]                           f32
    wx_ref : (t_chunk, BT, Hp)    VMEM  precomputed (x @ W + b) slab            wx dtype
    u_ref  : (Hp, Hp)             VMEM  recurrent weight                        mm dtype
    h_ref  : (BT, Hp)             VMEM  output block; resident across the time axis and
                                        used directly as the f32 recurrence state.
    """
    tb = pl.program_id(1)  # time-chunk index (sequential / "arbitrary")

    @pl.when(tb == 0)
    def _():
        h_ref[...] = jnp.zeros_like(h_ref)

    u = u_ref[...]
    # Hoist the scalar->vector broadcasts out of the unrolled time loop
    # (JAX does not CSE broadcast_in_dim).
    alpha_v = jnp.full(h_ref.shape, ab_ref[0], jnp.float32)
    beta_v = jnp.full(h_ref.shape, ab_ref[1], jnp.float32)

    def step(i, h):
        # Only h_{t-1} @ U runs on the MXU inside the recurrence (f32 accumulation);
        # the W projection was hoisted out entirely and streams in as wx.
        pre = wx_ref[i].astype(jnp.float32) + jnp.dot(
            h.astype(u.dtype), u, preferred_element_type=jnp.float32)
        h_new = alpha_v * jnp.tanh(pre) + beta_v * h
        if t_total % t_chunk:  # only emit the mask when the time axis was padded
            h_new = jnp.where(tb * t_chunk + i < t_total, h_new, h)
        return h_new

    # Partial unroll: enough LLO scheduling visibility to overlap the next-step wx
    # loads / MXU pushes behind the tanh+blend tail, without the vreg spills a full
    # unroll would cause at large batch tiles.
    h_ref[...] = jax.lax.fori_loop(0, t_chunk, step, h_ref[...],
                                   unroll=min(8, t_chunk))


def fastgrnn_forward(x, params, *, wx_dtype=jnp.bfloat16, matmul_dtype=None, t_chunk=64):
    """x: (B, T, D_in) float32.  Returns logits (B, num_classes) float32."""
    B, T, D = x.shape
    W, U = params["W"], params["U"]
    bias = params["b_W"] + params["b_U"]
    fcW, fcb = params["fcW"], params["fcb"]
    H = W.shape[1]

    if matmul_dtype is None:
        # bf16 MXU inputs on real TPUs; f32 fallback on backends (e.g. CPU interpret)
        # that cannot execute BF16 x BF16 -> F32 dots.
        matmul_dtype = jnp.bfloat16 if jax.default_backend() == "tpu" else jnp.float32

    Hp = _round_up(H, 128)                      # lane-dense hidden dim

    # Batch tile: as large as possible (feeds the MXU rows) while keeping >= 2 tiles
    # when the batch allows, so v7x's two TensorCores can both be sharded onto the
    # "parallel" batch axis.
    bp8 = _round_up(B, 8)
    if bp8 >= 16:
        B_TILE = min(128, _round_up(bp8 // 2, 8))
    else:
        B_TILE = bp8
    Bp = _round_up(B, B_TILE)

    # Time chunk: large enough to amortize the ~0.35us per-grid-step overhead, capped
    # so the double-buffered wx slab stays within ~8 MiB of VMEM.
    TC = max(1, min(t_chunk, T))
    per_step_bytes = 2 * B_TILE * Hp * jnp.dtype(wx_dtype).itemsize  # double-buffered
    TC = max(1, min(TC, (8 * 1024 * 1024) // max(1, per_step_bytes)))
    Tp = _round_up(T, TC)

    # Zero-pad the hidden dim; padded h columns provably stay exactly zero.
    W_p = jnp.pad(W, ((0, 0), (0, Hp - H))).astype(matmul_dtype)
    U_p = jnp.pad(U, ((0, Hp - H), (0, Hp - H))).astype(matmul_dtype)
    b_p = jnp.pad(bias, (0, Hp - H)).astype(jnp.float32)

    # Hoisted input projection: transpose x (only D columns -> cheap) to time-major
    # first, then one big matmul; avoids a full (T, B, Hp) transpose of the output.
    xt = jnp.transpose(x, (1, 0, 2)).astype(matmul_dtype)            # (T, B, D)
    wx = jnp.einsum("tbd,dh->tbh", xt, W_p,
                    preferred_element_type=jnp.float32) + b_p[None, None, :]
    wx = wx.astype(wx_dtype)                                         # bf16 HBM stream
    wx = jnp.pad(wx, ((0, Tp - T), (0, Bp - B), (0, 0)))             # zero time/batch pad

    ab = jnp.stack([params["alpha"], params["beta"]]).astype(jnp.float32)  # (2,) SMEM

    n_bt = Bp // B_TILE
    n_tb = Tp // TC

    kernel = functools.partial(_fastgrnn_recurrence_kernel, t_total=T, t_chunk=TC)

    # VMEM footprint: double-buffered wx slabs + (double-buffered) U + resident h.
    vmem_bytes = (2 * TC * B_TILE * Hp * jnp.dtype(wx_dtype).itemsize
                  + 2 * Hp * Hp * jnp.dtype(matmul_dtype).itemsize
                  + B_TILE * Hp * 4)
    vmem_limit = int(min(64 * 1024 * 1024, max(32 * 1024 * 1024, 2 * vmem_bytes)))
    # TODO(synk): for very large Hp, single-buffer U (constant index_map) via
    # pipeline_mode=pl.Buffered(1) to halve its VMEM footprint.

    h_last = pl.pallas_call(
        kernel,
        out_shape=jax.ShapeDtypeStruct((Bp, Hp), jnp.float32),
        grid_spec=pltpu.PrefetchScalarGridSpec(
            num_scalar_prefetch=0,
            grid=(n_bt, n_tb),
            in_specs=[
                pl.BlockSpec(memory_space=pltpu.SMEM),                       # [alpha, beta]
                pl.BlockSpec((TC, B_TILE, Hp), lambda bt, tb: (tb, bt, 0)),  # wx slab
                pl.BlockSpec((Hp, Hp), lambda bt, tb: (0, 0)),               # U
            ],
            out_specs=pl.BlockSpec((B_TILE, Hp), lambda bt, tb: (bt, 0)),    # h state/out
        ),
        compiler_params=pltpu.CompilerParams(
            # Batch tiles shard across v7x's two TensorCores; time stays sequential.
            dimension_semantics=("parallel", "arbitrary"),
            vmem_limit_bytes=vmem_limit,
        ),
    )(ab, wx, U_p)

    # Final classifier: one-shot f32 matmul, kept out of the recurrent kernel.
    return h_last[:B, :H] @ fcW + fcb


def init_params(key, input_dim, hidden_dim, num_classes):
    """Deterministic parameter init (uniform like nn.Linear default), weights (in, out)."""
    ks = jax.random.split(key, 6)

    def linear_init(kw, kb, fan_in, shape_w, shape_b):
        bound = 1.0 / jnp.sqrt(fan_in)
        w = jax.random.uniform(kw, shape_w, jnp.float32, -bound, bound)
        b = jax.random.uniform(kb, shape_b, jnp.float32, -bound, bound)
        return w, b

    W, b_W = linear_init(ks[0], ks[1], input_dim, (input_dim, hidden_dim), (hidden_dim,))
    U, b_U = linear_init(ks[2], ks[3], hidden_dim, (hidden_dim, hidden_dim), (hidden_dim,))
    fcW, fcb = linear_init(ks[4], ks[5], hidden_dim, (hidden_dim, num_classes), (num_classes,))

    return {
        "W": W, "b_W": b_W,
        "U": U, "b_U": b_U,
        "alpha": jnp.float32(0.5),
        "beta": jnp.float32(0.5),
        "fcW": fcW, "fcb": fcb,
    }


def fastgrnn_reference(x, params):
    """Pure-JAX f32 reference of the PyTorch forward, for verification."""
    B, T, D = x.shape
    H = params["W"].shape[1]
    h = jnp.zeros((B, H), jnp.float32)
    for t in range(T):
        x_t = x[:, t, :]
        pre = x_t @ params["W"] + params["b_W"] + h @ params["U"] + params["b_U"]
        h = params["alpha"] * jnp.tanh(pre) + params["beta"] * h
    return h @ params["fcW"] + params["fcb"]


if __name__ == "__main__":
    key = jax.random.PRNGKey(0)
    k_x, k_p = jax.random.split(key)

    batch, seq_len, input_dim, hidden_dim, num_classes = 2, 8, 16, 32, 10
    x = jax.random.normal(k_x, (batch, seq_len, input_dim), jnp.float32)
    params = init_params(k_p, input_dim, hidden_dim, num_classes)

    ref = fastgrnn_reference(x, params)

    fwd = jax.jit(fastgrnn_forward,
                  static_argnames=("wx_dtype", "matmul_dtype", "t_chunk"))

    # Exactness check: all-f32 path must match the f32 reference tightly.
    out_f32 = jax.block_until_ready(
        fwd(x, params, wx_dtype=jnp.float32, matmul_dtype=jnp.float32))
    assert out_f32.shape == (batch, num_classes)
    assert jnp.allclose(out_f32, ref, atol=1e-4, rtol=1e-4), (
        f"f32 path mismatch: max abs err {jnp.max(jnp.abs(out_f32 - ref))}"
    )

    # Performance path: bf16 wx stream (+ bf16 MXU inputs when running on a real TPU).
    out_fast = jax.block_until_ready(fwd(x, params))
    assert out_fast.shape == (batch, num_classes)
    assert jnp.allclose(out_fast, ref, atol=5e-2, rtol=5e-2), (
        f"fast path mismatch: max abs err {jnp.max(jnp.abs(out_fast - ref))}"
    )

    print("KERNEL_OK")
</pallas_src>

<mosaic_0001>
module attributes {stable_mosaic.version = 11 : i64} {
  func.func @_fastgrnn_recurrence_kernel(%arg0: i32, %arg1: i32, %arg2: memref<2xf32, #tpu.memory_space<smem>>, %arg3: memref<8x8x128xf32, #tpu.memory_space<vmem>>, %arg4: memref<128x128xf32, #tpu.memory_space<vmem>>, %arg5: memref<8x128xf32, #tpu.memory_space<vmem>>) attributes {dimension_semantics = [#tpu.dimension_semantics<parallel>, #tpu.dimension_semantics<arbitrary>], iteration_bounds = array<i64: 1, 1>, scalar_prefetch = 0 : i64, scratch_operands = 0 : i64, tpu.core_type = #tpu.core_type<tc>, window_params = [{transform_indices = @transform_0, window_bounds = array<i64: 2>}, {transform_indices = @transform_1, window_bounds = array<i64: 8, 8, 128>}, {pipeline_mode = #tpu.pipeline_mode<synchronous>, transform_indices = @transform_2, window_bounds = array<i64: 128, 128>}, {transform_indices = @transform_3, window_bounds = array<i64: 8, 128>}]} {
    %c0_i32 = arith.constant 0 : i32
    %0 = arith.cmpi eq, %arg1, %c0_i32 : i32
    %1 = arith.extui %0 : i1 to i32
    %c0_i32_0 = arith.constant 0 : i32
    %2 = arith.cmpi ne, %1, %c0_i32_0 : i32
    scf.if %2 {
      %cst_31 = arith.constant 0.000000e+00 : f32
      %82 = vector.broadcast %cst_31 : f32 to vector<8x128xf32>
      %c0_32 = arith.constant 0 : index
      %c0_33 = arith.constant 0 : index
      %83 = vector.load %arg5[%c0_32, %c0_33] : memref<8x128xf32, #tpu.memory_space<vmem>>, vector<8x128xf32>
      tpu.vector_store %arg5[%c0_32, %c0_33], %82 {strides = array<i32>} : memref<8x128xf32, #tpu.memory_space<vmem>>, vector<8x128xf32>,
    } else {
    }
    %c0 = arith.constant 0 : index
    %c0_1 = arith.constant 0 : index
    %3 = vector.load %arg4[%c0, %c0_1] : memref<128x128xf32, #tpu.memory_space<vmem>>, vector<128x128xf32>
    %c0_2 = arith.constant 0 : index
    %4 = memref.load %arg2[%c0_2] : memref<2xf32, #tpu.memory_space<smem>>
    %5 = vector.broadcast %4 : f32 to vector<8x128xf32>
    %c1 = arith.constant 1 : index
    %6 = memref.load %arg2[%c1] : memref<2xf32, #tpu.memory_space<smem>>
    %7 = vector.broadcast %6 : f32 to vector<8x128xf32>
    %c0_3 = arith.constant 0 : index
    %c0_4 = arith.constant 0 : index
    %8 = vector.load %arg5[%c0_3, %c0_4] : memref<8x128xf32, #tpu.memory_space<vmem>>, vector<8x128xf32>
    %c0_i32_5 = arith.constant 0 : i32
    %9 = arith.index_cast %c0_i32_5 : i32 to index
    %c0_6 = arith.constant 0 : index
    %c0_7 = arith.constant 0 : index
    %10 = vector.load %arg3[%9, %c0_6, %c0_7] : memref<8x8x128xf32, #tpu.memory_space<vmem>>, vector<1x8x128xf32>
    %11 = vector.shape_cast %10 : vector<1x8x128xf32> to vector<8x128xf32>
    %cst = arith.constant dense<0.000000e+00> : vector<8x128xf32>
    %12 = tpu.matmul %8, %3, %cst {dimension_numbers = #tpu.dot_dimension_numbers<[1], [0], [0], [1], [0, 0, 1, 1], [], []>} : vector<8x128xf32>, vector<128x128xf32>, vector<8x128xf32> -> vector<8x128xf32>
    %13 = arith.addf %11, %12 : vector<8x128xf32>
    %14 = math.tanh %13 : vector<8x128xf32>
    %15 = arith.mulf %5, %14 : vector<8x128xf32>
    %16 = arith.mulf %7, %8 : vector<8x128xf32>
    %17 = arith.addf %15, %16 : vector<8x128xf32>
    %c1_i32 = arith.constant 1 : i32
    %18 = arith.index_cast %c1_i32 : i32 to index
    %c0_8 = arith.constant 0 : index
    %c0_9 = arith.constant 0 : index
    %19 = vector.load %arg3[%18, %c0_8, %c0_9] : memref<8x8x128xf32, #tpu.memory_space<vmem>>, vector<1x8x128xf32>
    %20 = vector.shape_cast %19 : vector<1x8x128xf32> to vector<8x128xf32>
    %cst_10 = arith.constant dense<0.000000e+00> : vector<8x128xf32>
    %21 = tpu.matmul %17, %3, %cst_10 {dimension_numbers = #tpu.dot_dimension_numbers<[1], [0], [0], [1], [0, 0, 1, 1], [], []>} : vector<8x128xf32>, vector<128x128xf32>, vector<8x128xf32> -> vector<8x128xf32>
    %22 = arith.addf %20, %21 : vector<8x128xf32>
    %23 = math.tanh %22 : vector<8x128xf32>
    %24 = arith.mulf %5, %23 : vector<8x128xf32>
    %25 = arith.mulf %7, %17 : vector<8x128xf32>
    %26 = arith.addf %24, %25 : vector<8x128xf32>
    %c2_i32 = arith.constant 2 : i32
    %27 = arith.index_cast %c2_i32 : i32 to index
    %c0_11 = arith.constant 0 : index
    %c0_12 = arith.constant 0 : index
    %28 = vector.load %arg3[%27, %c0_11, %c0_12] : memref<8x8x128xf32, #tpu.memory_space<vmem>>, vector<1x8x128xf32>
    %29 = vector.shape_cast %28 : vector<1x8x128xf32> to vector<8x128xf32>
    %cst_13 = arith.constant dense<0.000000e+00> : vector<8x128xf32>
    %30 = tpu.matmul %26, %3, %cst_13 {dimension_numbers = #tpu.dot_dimension_numbers<[1], [0], [0], [1], [0, 0, 1, 1], [], []>} : vector<8x128xf32>, vector<128x128xf32>, vector<8x128xf32> -> vector<8x128xf32>
    %31 = arith.addf %29, %30 : vector<8x128xf32>
    %32 = math.tanh %31 : vector<8x128xf32>
    %33 = arith.mulf %5, %32 : vector<8x128xf32>
    %34 = arith.mulf %7, %26 : vector<8x128xf32>
    %35 = arith.addf %33, %34 : vector<8x128xf32>
    %c3_i32 = arith.constant 3 : i32
    %36 = arith.index_cast %c3_i32 : i32 to index
    %c0_14 = arith.constant 0 : index
    %c0_15 = arith.constant 0 : index
    %37 = vector.load %arg3[%36, %c0_14, %c0_15] : memref<8x8x128xf32, #tpu.memory_space<vmem>>, vector<1x8x128xf32>
    %38 = vector.shape_cast %37 : vector<1x8x128xf32> to vector<8x128xf32>
    %cst_16 = arith.constant dense<0.000000e+00> : vector<8x128xf32>
    %39 = tpu.matmul %35, %3, %cst_16 {dimension_numbers = #tpu.dot_dimension_numbers<[1], [0], [0], [1], [0, 0, 1, 1], [], []>} : vector<8x128xf32>, vector<128x128xf32>, vector<8x128xf32> -> vector<8x128xf32>
    %40 = arith.addf %38, %39 : vector<8x128xf32>
    %41 = math.tanh %40 : vector<8x128xf32>
    %42 = arith.mulf %5, %41 : vector<8x128xf32>
    %43 = arith.mulf %7, %35 : vector<8x128xf32>
    %44 = arith.addf %42, %43 : vector<8x128xf32>
    %c4_i32 = arith.constant 4 : i32
    %45 = arith.index_cast %c4_i32 : i32 to index
    %c0_17 = arith.constant 0 : index
    %c0_18 = arith.constant 0 : index
    %46 = vector.load %arg3[%45, %c0_17, %c0_18] : memref<8x8x128xf32, #tpu.memory_space<vmem>>, vector<1x8x128xf32>
    %47 = vector.shape_cast %46 : vector<1x8x128xf32> to vector<8x128xf32>
    %cst_19 = arith.constant dense<0.000000e+00> : vector<8x128xf32>
    %48 = tpu.matmul %44, %3, %cst_19 {dimension_numbers = #tpu.dot_dimension_numbers<[1], [0], [0], [1], [0, 0, 1, 1], [], []>} : vector<8x128xf32>, vector<128x128xf32>, vector<8x128xf32> -> vector<8x128xf32>
    %49 = arith.addf %47, %48 : vector<8x128xf32>
    %50 = math.tanh %49 : vector<8x128xf32>
    %51 = arith.mulf %5, %50 : vector<8x128xf32>
    %52 = arith.mulf %7, %44 : vector<8x128xf32>
    %53 = arith.addf %51, %52 : vector<8x128xf32>
    %c5_i32 = arith.constant 5 : i32
    %54 = arith.index_cast %c5_i32 : i32 to index
    %c0_20 = arith.constant 0 : index
    %c0_21 = arith.constant 0 : index
    %55 = vector.load %arg3[%54, %c0_20, %c0_21] : memref<8x8x128xf32, #tpu.memory_space<vmem>>, vector<1x8x128xf32>
    %56 = vector.shape_cast %55 : vector<1x8x128xf32> to vector<8x128xf32>
    %cst_22 = arith.constant dense<0.000000e+00> : vector<8x128xf32>
    %57 = tpu.matmul %53, %3, %cst_22 {dimension_numbers = #tpu.dot_dimension_numbers<[1], [0], [0], [1], [0, 0, 1, 1], [], []>} : vector<8x128xf32>, vector<128x128xf32>, vector<8x128xf32> -> vector<8x128xf32>
    %58 = arith.addf %56, %57 : vector<8x128xf32>
    %59 = math.tanh %58 : vector<8x128xf32>
    %60 = arith.mulf %5, %59 : vector<8x128xf32>
    %61 = arith.mulf %7, %53 : vector<8x128xf32>
    %62 = arith.addf %60, %61 : vector<8x128xf32>
    %c6_i32 = arith.constant 6 : i32
    %63 = arith.index_cast %c6_i32 : i32 to index
    %c0_23 = arith.constant 0 : index
    %c0_24 = arith.constant 0 : index
    %64 = vector.load %arg3[%63, %c0_23, %c0_24] : memref<8x8x128xf32, #tpu.memory_space<vmem>>, vector<1x8x128xf32>
    %65 = vector.shape_cast %64 : vector<1x8x128xf32> to vector<8x128xf32>
    %cst_25 = arith.constant dense<0.000000e+00> : vector<8x128xf32>
    %66 = tpu.matmul %62, %3, %cst_25 {dimension_numbers = #tpu.dot_dimension_numbers<[1], [0], [0], [1], [0, 0, 1, 1], [], []>} : vector<8x128xf32>, vector<128x128xf32>, vector<8x128xf32> -> vector<8x128xf32>
    %67 = arith.addf %65, %66 : vector<8x128xf32>
    %68 = math.tanh %67 : vector<8x128xf32>
    %69 = arith.mulf %5, %68 : vector<8x128xf32>
    %70 = arith.mulf %7, %62 : vector<8x128xf32>
    %71 = arith.addf %69, %70 : vector<8x128xf32>
    %c7_i32 = arith.constant 7 : i32
    %72 = arith.index_cast %c7_i32 : i32 to index
    %c0_26 = arith.constant 0 : index
    %c0_27 = arith.constant 0 : index
    %73 = vector.load %arg3[%72, %c0_26, %c0_27] : memref<8x8x128xf32, #tpu.memory_space<vmem>>, vector<1x8x128xf32>
    %74 = vector.shape_cast %73 : vector<1x8x128xf32> to vector<8x128xf32>
    %cst_28 = arith.constant dense<0.000000e+00> : vector<8x128xf32>
    %75 = tpu.matmul %71, %3, %cst_28 {dimension_numbers = #tpu.dot_dimension_numbers<[1], [0], [0], [1], [0, 0, 1, 1], [], []>} : vector<8x128xf32>, vector<128x128xf32>, vector<8x128xf32> -> vector<8x128xf32>
    %76 = arith.addf %74, %75 : vector<8x128xf32>
    %77 = math.tanh %76 : vector<8x128xf32>
    %78 = arith.mulf %5, %77 : vector<8x128xf32>
    %79 = arith.mulf %7, %71 : vector<8x128xf32>
    %80 = arith.addf %78, %79 : vector<8x128xf32>
    %c8_i32 = arith.constant 8 : i32
    %c0_29 = arith.constant 0 : index
    %c0_30 = arith.constant 0 : index
    %81 = vector.load %arg5[%c0_29, %c0_30] : memref<8x128xf32, #tpu.memory_space<vmem>>, vector<8x128xf32>
    tpu.vector_store %arg5[%c0_29, %c0_30], %80 {strides = array<i32>} : memref<8x128xf32, #tpu.memory_space<vmem>>, vector<8x128xf32>,
    return
  }
  func.func @transform_0(%arg0: i32, %arg1: i32) -> i32 {
    %c0_i32 = arith.constant 0 : i32
    %c0_i32_0 = arith.constant 0 : i32
    return %c0_i32 : i32
  }
  func.func @transform_1(%arg0: i32, %arg1: i32) -> (i32, i32, i32) {
    %c0_i32 = arith.constant 0 : i32
    %c0_i32_0 = arith.constant 0 : i32
    return %arg1, %arg0, %c0_i32 : i32, i32, i32
  }
  func.func @transform_2(%arg0: i32, %arg1: i32) -> (i32, i32) {
    %c0_i32 = arith.constant 0 : i32
    %c0_i32_0 = arith.constant 0 : i32
    %c0_i32_1 = arith.constant 0 : i32
    return %c0_i32, %c0_i32_0 : i32, i32
  }
  func.func @transform_3(%arg0: i32, %arg1: i32) -> (i32, i32) {
    %c0_i32 = arith.constant 0 : i32
    %c0_i32_0 = arith.constant 0 : i32
    return %arg0, %c0_i32 : i32, i32
  }
}

</mosaic_0001>

<bundles_post_ra>
// kernel: fastgrnn_forward.1
= control target key start
LH: loop header
LB: loop body
LE: loop exit
PB: predicated region body
PF: predicated region fallthrough
CT: control target
= control target key end

     0   :  { %8 = vsyncpa [#allocation3], 0  ;;  %s314_s15 = smov [#allocation2]   ;;  %s594_s0 = inlined_call_operand.vmem [shape: f32[2], index: 0, kind: input, shape index: {}]   ;;  %s595_s1 = inlined_call_operand.vmem [shape: f32[8,8,128], index: 1, kind: input, shape index: {}]   ;;  %s596_s2 = inlined_call_operand.vmem [shape: f32[128,128], index: 2, kind: input, shape index: {}]   ;;  %s597_s3 = inlined_call_operand.vmem [shape: f32[8,128], index: 3, kind: output, shape index: {}]  }
   0x1   :  { %s14_s14 = sshll.u32 %s594_s0, 4  ;;  %s15_s14 = int_to_ptr.vmem [resolvable:$true] %s14_s14 }
   0x2   :  { %17 = dma.vmem_to_smem %s15_s14, 16, %s314_s15, [#allocation3]  }
   0x3   :  { %312 = dma.done.wait [#allocation3], 16  }
   0x4   :  { %313 = vsyncadd [#allocation3], 4294967280 }
   0x5   :  { %26 = sfence }
   0x6   :  { %v342_v0 = vld [vmem:[%s596_s2 + $0x78] sm:$0xff]  ;;  %v347_v1 = vld [vmem:[%s596_s2 + $0x70] sm:$0xff]  ;;  %v354_v2 = vld [vmem:[%s596_s2 + $0x68] sm:$0xff]  ;;  %v315_v16 = vmov 0.0   ;;  %s48_s21 = sld [smem:[#allocation2]] }
   0x7   :  { %54 = vmatpush.msra.mxu0 %v342_v0  ;;  %81 = vmatpush.msra.mxu1 %v342_v0  ;;  %v363_v3 = vld [vmem:[%s596_s2 + $0x60] sm:$0xff]  ;;  %v372_v4 = vld [vmem:[%s596_s2 + $0x58] sm:$0xff]  ;;  %v381_v5 = vld [vmem:[%s596_s2 + $0x50] sm:$0xff] }
   0x8   :  { %108 = vmatpush.msra.mxu2 %v342_v0  ;;  %135 = vmatpush.msra.mxu3 %v342_v0  ;;  %v390_v6 = vld [vmem:[%s596_s2 + $0x48] sm:$0xff]  ;;  %v399_v7 = vld [vmem:[%s596_s2 + $0x40] sm:$0xff]  ;;  %v408_v8 = vld [vmem:[%s596_s2 + $0x38] sm:$0xff] }
   0x9   :  { %55 = vmatpush.msra.mxu0 %v347_v1  ;;  %82 = vmatpush.msra.mxu1 %v347_v1  ;;  %v417_v9 = vld [vmem:[%s596_s2 + $0x30] sm:$0xff]  ;;  %v426_v10 = vld [vmem:[%s596_s2 + $0x28] sm:$0xff]  ;;  %v435_v11 = vld [vmem:[%s596_s2 + $0x20] sm:$0xff] }
   0xa   :  { %109 = vmatpush.msra.mxu2 %v347_v1  ;;  %136 = vmatpush.msra.mxu3 %v347_v1  ;;  %v444_v12 = vld [vmem:[%s596_s2 + $0x18] sm:$0xff]  ;;  %v453_v13 = vld [vmem:[%s596_s2 + $0x10] sm:$0xff]  ;;  %v462_v14 = vld [vmem:[%s596_s2 + $0x8] sm:$0xff] }
   0xb   :  { %56 = vmatpush.msra.mxu0 %v354_v2  ;;  %83 = vmatpush.msra.mxu1 %v354_v2  ;;  %v471_v15 = vld [vmem:[%s596_s2] sm:$0xff]  ;;  %s274_s2 = sld [smem:[#allocation2 + $0x1]]  ;;  %v275_v26 = vld [vmem:[%s595_s1 + $0x8] sm:$0xff]  ;;  %v276_v33 = vld [vmem:[%s595_s1 + $0x10] sm:$0xff] }
   0xc   :  { %110 = vmatpush.msra.mxu2 %v354_v2  ;;  %137 = vmatpush.msra.mxu3 %v354_v2  ;;  %v53_v17 = vld [vmem:[%s595_s1] sm:$0xff]  ;;  %v552_v21 = vstv %s48_s21  ;;  %v277_v40 = vld [vmem:[%s595_s1 + $0x18] sm:$0xff]  ;;  %v279_v54 = vld [vmem:[%s595_s1 + $0x28] sm:$0xff] }
   0xd   :  { %57 = vmatpush.msra.mxu0 %v363_v3  ;;  %84 = vmatpush.msra.mxu1 %v363_v3  ;;  %v278_v47 = vld [vmem:[%s595_s1 + $0x20] sm:$0xff]  ;;  %v280_v61 = vld [vmem:[%s595_s1 + $0x30] sm:$0xff] }
   0xe   :  { %111 = vmatpush.msra.mxu2 %v363_v3  ;;  %138 = vmatpush.msra.mxu3 %v363_v3 }
   0xf   :  { %58 = vmatpush.msra.mxu0 %v372_v4  ;;  %85 = vmatpush.msra.mxu1 %v372_v4 }
  0x10   :  { %112 = vmatpush.msra.mxu2 %v372_v4  ;;  %139 = vmatpush.msra.mxu3 %v372_v4 }
  0x11   :  { %59 = vmatpush.msra.mxu0 %v381_v5  ;;  %86 = vmatpush.msra.mxu1 %v381_v5  ;;  %v550_v20 = vstv %s274_s2 }
  0x12   :  { %113 = vmatpush.msra.mxu2 %v381_v5  ;;  %140 = vmatpush.msra.mxu3 %v381_v5  ;;  %v77_v22 = vmul.f32 0.0, %v550_v20 }
  0x13   :  { %60 = vmatpush.msra.mxu0 %v390_v6  ;;  %87 = vmatpush.msra.mxu1 %v390_v6 }
  0x14   :  { %114 = vmatpush.msra.mxu2 %v390_v6  ;;  %141 = vmatpush.msra.mxu3 %v390_v6 }
  0x15   :  { %61 = vmatpush.msra.mxu0 %v399_v7  ;;  %88 = vmatpush.msra.mxu1 %v399_v7 }
  0x16   :  { %115 = vmatpush.msra.mxu2 %v399_v7  ;;  %142 = vmatpush.msra.mxu3 %v399_v7 }
  0x17   :  { %62 = vmatpush.msra.mxu0 %v408_v8  ;;  %89 = vmatpush.msra.mxu1 %v408_v8 }
  0x18   :  { %116 = vmatpush.msra.mxu2 %v408_v8  ;;  %143 = vmatpush.msra.mxu3 %v408_v8 }
  0x19   :  { %63 = vmatpush.msra.mxu0 %v417_v9  ;;  %90 = vmatpush.msra.mxu1 %v417_v9 }
  0x1a   :  { %117 = vmatpush.msra.mxu2 %v417_v9  ;;  %144 = vmatpush.msra.mxu3 %v417_v9 }
  0x1b   :  { %64 = vmatpush.msra.mxu0 %v426_v10  ;;  %91 = vmatpush.msra.mxu1 %v426_v10 }
  0x1c   :  { %118 = vmatpush.msra.mxu2 %v426_v10  ;;  %145 = vmatpush.msra.mxu3 %v426_v10 }
  0x1d   :  { %65 = vmatpush.msra.mxu0 %v435_v11  ;;  %92 = vmatpush.msra.mxu1 %v435_v11 }
  0x1e   :  { %119 = vmatpush.msra.mxu2 %v435_v11  ;;  %146 = vmatpush.msra.mxu3 %v435_v11 }
  0x1f   :  { %66 = vmatpush.msra.mxu0 %v444_v12  ;;  %93 = vmatpush.msra.mxu1 %v444_v12 }
  0x20   :  { %120 = vmatpush.msra.mxu2 %v444_v12  ;;  %147 = vmatpush.msra.mxu3 %v444_v12 }
  0x21   :  { %67 = vmatpush.msra.mxu0 %v453_v13  ;;  %94 = vmatpush.msra.mxu1 %v453_v13 }
  0x22   :  { %121 = vmatpush.msra.mxu2 %v453_v13  ;;  %148 = vmatpush.msra.mxu3 %v453_v13 }
  0x23   :  { %68 = vmatpush.msra.mxu0 %v462_v14  ;;  %95 = vmatpush.msra.mxu1 %v462_v14 }
  0x24   :  { %122 = vmatpush.msra.mxu2 %v462_v14  ;;  %149 = vmatpush.msra.mxu3 %v462_v14 }
  0x25   :  { %69 = vmatpush.msra.mxu0 %v471_v15  ;;  %96 = vmatpush.msra.mxu1 %v471_v15 }
  0x26   :  { %70 = vmatmul.f32.vlgmr.msra.gmra.mxu0 %v315_v16  ;;  %123 = vmatpush.msra.mxu2 %v471_v15 }
  0x27   :  { %150 = vmatpush.msra.mxu3 %v471_v15  ;;  %162 = vmatpush.msrb.mxu0 %v342_v0 }
  0x28   :  { %189 = vmatpush.msrb.mxu1 %v342_v0  ;;  %216 = vmatpush.msrb.mxu2 %v342_v0 }
  0x29   :  { %163 = vmatpush.msrb.mxu0 %v347_v1  ;;  %243 = vmatpush.msrb.mxu3 %v342_v0 }
  0x2a   :  { %190 = vmatpush.msrb.mxu1 %v347_v1  ;;  %217 = vmatpush.msrb.mxu2 %v347_v1 }
  0x2b   :  { %164 = vmatpush.msrb.mxu0 %v354_v2  ;;  %244 = vmatpush.msrb.mxu3 %v347_v1 }
  0x2c   :  { %191 = vmatpush.msrb.mxu1 %v354_v2  ;;  %218 = vmatpush.msrb.mxu2 %v354_v2 }
  0x2d   :  { %165 = vmatpush.msrb.mxu0 %v363_v3  ;;  %245 = vmatpush.msrb.mxu3 %v354_v2 }
  0x2e   :  { %192 = vmatpush.msrb.mxu1 %v363_v3  ;;  %219 = vmatpush.msrb.mxu2 %v363_v3 }
  0x2f   :  { %166 = vmatpush.msrb.mxu0 %v372_v4  ;;  %246 = vmatpush.msrb.mxu3 %v363_v3 }
  0x30   :  { %193 = vmatpush.msrb.mxu1 %v372_v4  ;;  %220 = vmatpush.msrb.mxu2 %v372_v4 }
  0x31   :  { %167 = vmatpush.msrb.mxu0 %v381_v5  ;;  %247 = vmatpush.msrb.mxu3 %v372_v4  ;;  %v281_v4 = vld [vmem:[%s595_s1 + $0x38] sm:$0xff] }
  0x32   :  { %194 = vmatpush.msrb.mxu1 %v381_v5  ;;  %221 = vmatpush.msrb.mxu2 %v381_v5 }
  0x33   :  { %168 = vmatpush.msrb.mxu0 %v390_v6  ;;  %248 = vmatpush.msrb.mxu3 %v381_v5 }
  0x34   :  { %195 = vmatpush.msrb.mxu1 %v390_v6  ;;  %222 = vmatpush.msrb.mxu2 %v390_v6 }
  0x35   :  { %169 = vmatpush.msrb.mxu0 %v399_v7  ;;  %249 = vmatpush.msrb.mxu3 %v390_v6 }
  0x36   :  { %196 = vmatpush.msrb.mxu1 %v399_v7  ;;  %223 = vmatpush.msrb.mxu2 %v399_v7 }
  0x37   :  { %170 = vmatpush.msrb.mxu0 %v408_v8  ;;  %250 = vmatpush.msrb.mxu3 %v399_v7 }
  0x38   :  { %197 = vmatpush.msrb.mxu1 %v408_v8  ;;  %224 = vmatpush.msrb.mxu2 %v408_v8 }
  0x39   :  { %171 = vmatpush.msrb.mxu0 %v417_v9  ;;  %251 = vmatpush.msrb.mxu3 %v408_v8 }
  0x3a   :  { %198 = vmatpush.msrb.mxu1 %v417_v9  ;;  %225 = vmatpush.msrb.mxu2 %v417_v9 }
  0x3b   :  { %172 = vmatpush.msrb.mxu0 %v426_v10  ;;  %252 = vmatpush.msrb.mxu3 %v417_v9 }
  0x3c   :  { %199 = vmatpush.msrb.mxu1 %v426_v10  ;;  %226 = vmatpush.msrb.mxu2 %v426_v10 }
  0x3d   :  { %173 = vmatpush.msrb.mxu0 %v435_v11  ;;  %253 = vmatpush.msrb.mxu3 %v426_v10 }
  0x3e   :  { %200 = vmatpush.msrb.mxu1 %v435_v11  ;;  %227 = vmatpush.msrb.mxu2 %v435_v11 }
  0x3f   :  { %174 = vmatpush.msrb.mxu0 %v444_v12  ;;  %254 = vmatpush.msrb.mxu3 %v435_v11 }
  0x40   :  { %201 = vmatpush.msrb.mxu1 %v444_v12  ;;  %228 = vmatpush.msrb.mxu2 %v444_v12 }
  0x41   :  { %175 = vmatpush.msrb.mxu0 %v453_v13  ;;  %255 = vmatpush.msrb.mxu3 %v444_v12 }
  0x42   :  { %202 = vmatpush.msrb.mxu1 %v453_v13  ;;  %229 = vmatpush.msrb.mxu2 %v453_v13 }
  0x43   :  { %176 = vmatpush.msrb.mxu0 %v462_v14  ;;  %256 = vmatpush.msrb.mxu3 %v453_v13 }
  0x44   :  { %203 = vmatpush.msrb.mxu1 %v462_v14  ;;  %230 = vmatpush.msrb.mxu2 %v462_v14 }
  0x45   :  { %177 = vmatpush.msrb.mxu0 %v471_v15  ;;  %257 = vmatpush.msrb.mxu3 %v462_v14 }
  0x46   :  { %204 = vmatpush.msrb.mxu1 %v471_v15  ;;  %231 = vmatpush.msrb.mxu2 %v471_v15 }
  0x47   :  { %258 = vmatpush.msrb.mxu3 %v471_v15 }
  0xa3   :  { %v71_v18 = vpop.f32.mrf.mxu0 }
  0xa4   :  { %v74_v19 = vadd.f32 %v71_v18, %v53_v17 }
  0xa6   :  { %284 = vtanh.f32 %v74_v19 }
  0xac   :  { %v285_v23 = vpop.eup %284 }
  0xad   :  { %v76_v24 = vmul.f32 %v285_v23, %v552_v21 }
  0xaf   :  { %v78_v25 = vadd.f32 %v77_v22, %v76_v24 }
  0xb1   :  { %97 = vmatmul.f32.vlgmr.msra.gmra.mxu1 %v78_v25  ;;  %v104_v31 = vmul.f32 %v78_v25, %v550_v20 }
 0x12e   :  { %v98_v27 = vpop.f32.mrf.mxu1 }
 0x12f   :  { %v101_v28 = vadd.f32 %v275_v26, %v98_v27 }
 0x131   :  { %286 = vtanh.f32 %v101_v28 }
 0x137   :  { %v287_v29 = vpop.eup %286 }
 0x138   :  { %v103_v30 = vmul.f32 %v287_v29, %v552_v21 }
 0x13a   :  { %v105_v32 = vadd.f32 %v104_v31, %v103_v30 }
 0x13c   :  { %124 = vmatmul.f32.vlgmr.msra.gmra.mxu2 %v105_v32  ;;  %v131_v38 = vmul.f32 %v105_v32, %v550_v20 }
 0x1bf   :  { %v125_v34 = vpop.f32.mrf.mxu2 }
 0x1c0   :  { %v128_v35 = vadd.f32 %v276_v33, %v125_v34 }
 0x1c2   :  { %288 = vtanh.f32 %v128_v35 }
 0x1c8   :  { %v289_v36 = vpop.eup %288 }
 0x1c9   :  { %v130_v37 = vmul.f32 %v289_v36, %v552_v21 }
 0x1cb   :  { %v132_v39 = vadd.f32 %v131_v38, %v130_v37 }
 0x1cd   :  { %151 = vmatmul.f32.vlgmr.msra.gmra.mxu3 %v132_v39  ;;  %v158_v44 = vmul.f32 %v132_v39, %v550_v20 }
 0x250   :  { %v152_v41 = vpop.f32.mrf.mxu3 }
 0x251   :  { %v155_v42 = vadd.f32 %v277_v40, %v152_v41 }
 0x253   :  { %290 = vtanh.f32 %v155_v42 }
 0x259   :  { %v291_v43 = vpop.eup %290 }
 0x25a   :  { %v157_v45 = vmul.f32 %v291_v43, %v552_v21 }
 0x25c   :  { %v159_v46 = vadd.f32 %v158_v44, %v157_v45 }
 0x25e   :  { %178 = vmatmul.f32.vlgmr.msrb.gmra.mxu0 %v159_v46  ;;  %v185_v52 = vmul.f32 %v159_v46, %v550_v20 }
 0x2db   :  { %v179_v48 = vpop.f32.mrf.mxu0 }
 0x2dc   :  { %v182_v49 = vadd.f32 %v278_v47, %v179_v48 }
 0x2de   :  { %292 = vtanh.f32 %v182_v49 }
 0x2e4   :  { %v293_v50 = vpop.eup %292 }
 0x2e5   :  { %v184_v51 = vmul.f32 %v293_v50, %v552_v21 }
 0x2e7   :  { %v186_v53 = vadd.f32 %v185_v52, %v184_v51 }
 0x2e9   :  { %205 = vmatmul.f32.vlgmr.msrb.gmra.mxu1 %v186_v53  ;;  %v212_v59 = vmul.f32 %v186_v53, %v550_v20 }
 0x366   :  { %v206_v55 = vpop.f32.mrf.mxu1 }
 0x367   :  { %v209_v56 = vadd.f32 %v279_v54, %v206_v55 }
 0x369   :  { %294 = vtanh.f32 %v209_v56 }
 0x36f   :  { %v295_v57 = vpop.eup %294 }
 0x370   :  { %v211_v58 = vmul.f32 %v295_v57, %v552_v21 }
 0x372   :  { %v213_v60 = vadd.f32 %v212_v59, %v211_v58 }
 0x374   :  { %232 = vmatmul.f32.vlgmr.msrb.gmra.mxu2 %v213_v60  ;;  %v239_v2 = vmul.f32 %v213_v60, %v550_v20 }
 0x3f7   :  { %v233_v62 = vpop.f32.mrf.mxu2 }
 0x3f8   :  { %v236_v63 = vadd.f32 %v280_v61, %v233_v62 }
 0x3fa   :  { %296 = vtanh.f32 %v236_v63 }
 0x400   :  { %v297_v0 = vpop.eup %296 }
 0x401   :  { %v238_v1 = vmul.f32 %v297_v0, %v552_v21 }
 0x403   :  { %v240_v3 = vadd.f32 %v239_v2, %v238_v1 }
 0x405   :  { %259 = vmatmul.f32.vlgmr.msrb.gmra.mxu3 %v240_v3  ;;  %v266_v8 = vmul.f32 %v240_v3, %v550_v20 }
 0x488   :  { %v260_v5 = vpop.f32.mrf.mxu3 }
 0x489   :  { %v263_v6 = vadd.f32 %v281_v4, %v260_v5 }
 0x48b   :  { %298 = vtanh.f32 %v263_v6 }
 0x491   :  { %v299_v7 = vpop.eup %298 }
 0x492   :  { %v265_v9 = vmul.f32 %v299_v7, %v552_v21 }
 0x494   :  { %v267_v10 = vadd.f32 %v266_v8, %v265_v9 }
 0x496   :  { %268 = vst [vmem:[%s597_s3] sm:$0xff] %v267_v10 }
 0x497   :  { %273 = vsyncpa [#allocation3], 1 }

</bundles_post_ra>
